<compile_context>
chip_gen: v5e
topology: v5e:2x2
jax: 0.10.0
libtpu: 0.0.40
codegen_flags: <defaults>
</compile_context>

<pallas_src>
import functools

import jax
import jax.numpy as jnp
from jax.experimental import pallas as pl
from jax.experimental.pallas import tpu as pltpu

IN_FEATURES = 5
IN_PAD = 8          # layer-1 contraction dim padded to a sublane multiple
HIDDEN = 128
LANE = 128
MIN_SPLIT_TILE = 1024   # don't shrink tiles below this just to feed 2 TCs


def _round_up(n, m):
    return ((n + m - 1) // m) * m


def pi_mlp_kernel(xT_ref,
                  w1_ref,
                  w2_ref, b2_ref,
                  w3_ref, b3_ref,
                  w4_ref, b4_ref,
                  out_ref):
    """One batch tile of the Pi MLP, computed in (features, batch) layout.

    Activations are (features, TB), so the final (1, TB) result is written
    with lane-dense (unmasked) stores.  Weights are bf16 and resident in VMEM
    across grid iterations; matmuls accumulate in f32 on the MXU, elementwise
    ops run in f32.  Layer-1 bias is folded into the matmul (xT row 5 = 1).
    """
    x = xT_ref[...]                                            # (8, TB) bf16

    # Layer 1 + bias (folded): (128, 8) @ (8, TB) -> (128, TB) f32
    h = jnp.dot(w1_ref[...], x, preferred_element_type=jnp.float32)
    h = jnp.maximum(h, 0.0)

    # Layer 2: (128, 128) @ (128, TB)
    h = jnp.dot(w2_ref[...], h.astype(jnp.bfloat16),
                preferred_element_type=jnp.float32)
    h = jnp.maximum(h + b2_ref[...], 0.0)

    # Layer 3: (128, 128) @ (128, TB)
    h = jnp.dot(w3_ref[...], h.astype(jnp.bfloat16),
                preferred_element_type=jnp.float32)
    h = jnp.maximum(h + b3_ref[...], 0.0)

    # Layer 4 (N=1): VPU multiply + cross-sublane reduce (XLU) instead of a
    # nearly-empty MXU pass; result is lane-dense (1, TB), fully f32.
    y = jnp.sum(h * w4_ref[...], axis=0, keepdims=True)        # (1, TB) f32
    out_ref[...] = jnp.tanh(y + b4_ref[...])


@functools.partial(jax.jit, static_argnames=("block_b",))
def pi_forward(x, params, *, block_b=2048):
    """Forward pass of Pi. x: (B, 5) float32 -> (B, 1) float32.

    params: PyTorch-layout [(W(out,in), b(out,)), ...] for the 4 Linear layers.
    """
    (w1, b1), (w2, b2), (w3, b3), (w4, b4) = params
    B, K = x.shape
    H = w1.shape[0]

    # --- batch tiling ------------------------------------------------------
    b_ceil = _round_up(max(B, 1), LANE)
    if b_ceil >= 2 * MIN_SPLIT_TILE:
        # Keep >= 2 parallel tiles so v7x's second TensorCore gets work,
        # without shrinking tiles below ~1024 (v5e/v6e unaffected).
        tb = min(block_b, _round_up(pl.cdiv(b_ceil, 2), LANE))
    else:
        tb = min(block_b, b_ceil)
    tb = max(tb, LANE)
    b_pad = _round_up(b_ceil, tb)
    n_tiles = b_pad // tb

    # --- operand staging ---------------------------------------------------
    # (B, 5) -> zero-padded, feature-major (8, B_pad) bf16 so kernel I/O is
    # lane-dense along the batch dimension and the input DMA is half-width.
    # Row 5 carries ones so the layer-1 bias rides along in the matmul.
    xT = jnp.zeros((IN_PAD, b_pad), jnp.bfloat16)
    xT = xT.at[:K, :B].set(x.T.astype(jnp.bfloat16))
    xT = xT.at[K, :].set(jnp.bfloat16(1.0))

    # Weights in bf16, PyTorch (out, in) layout (kernel computes W @ x^T).
    # Layer-1 weight: K padded 5 -> 8; column 5 holds the bias.
    w1p = jnp.zeros((H, IN_PAD), jnp.bfloat16)
    w1p = w1p.at[:, :K].set(w1.astype(jnp.bfloat16))
    w1p = w1p.at[:, K].set(b1.astype(jnp.bfloat16))
    w2p = w2.astype(jnp.bfloat16)
    w3p = w3.astype(jnp.bfloat16)
    w4c = w4.reshape(1, H).T.astype(jnp.float32)          # (128, 1), f32
    b2c = b2.reshape(H, 1).astype(jnp.float32)
    b3c = b3.reshape(H, 1).astype(jnp.float32)
    b4c = b4.reshape(1, 1).astype(jnp.float32)

    def resident(a):
        # Full array, same block every grid step -> stays pinned in VMEM.
        return pl.BlockSpec(a.shape, lambda i: (0,) * a.ndim)

    # Advisory cost estimate for XLA's scheduler around this small call.
    cost = pl.CostEstimate(
        flops=2 * b_pad * (IN_PAD * H + 2 * H * H + H),
        transcendentals=b_pad,                      # tanh
        bytes_accessed=(IN_PAD * b_pad * 2          # bf16 input
                        + b_pad * 4                 # f32 output
                        + (H * IN_PAD + 2 * H * H) * 2 + 3 * H * 4 + 4),
    )

    # Only very large tiles need an explicit scoped-VMEM bump (v5e default is
    # 16 MiB); the default tb=2048 working set is a few MB on all chips.
    vmem_limit = (64 * 1024 * 1024) if tb >= 4096 else None

    out = pl.pallas_call(
        pi_mlp_kernel,
        out_shape=jax.ShapeDtypeStruct((1, b_pad), jnp.float32),
        grid_spec=pltpu.PrefetchScalarGridSpec(
            num_scalar_prefetch=0,
            grid=(n_tiles,),
            in_specs=[pl.BlockSpec((IN_PAD, tb), lambda i: (0, i)),
                      resident(w1p),
                      resident(w2p), resident(b2c),
                      resident(w3p), resident(b3c),
                      resident(w4c), resident(b4c)],
            out_specs=pl.BlockSpec((1, tb), lambda i: (0, i)),
        ),
        compiler_params=pltpu.CompilerParams(
            # Batch tiles are independent -> megacore sharding on v7x.
            dimension_semantics=("parallel",),
            vmem_limit_bytes=vmem_limit,
        ),
        cost_estimate=cost,
    )(xT, w1p, w2p, b2c, w3p, b3c, w4c, b4c)

    return out[0, :B].reshape(B, 1)


def init_pi_params(key, hidden_layers=(128, 128, 128), in_features=IN_FEATURES):
    """PyTorch nn.Linear default init: U(-1/sqrt(fan_in), 1/sqrt(fan_in)).
    Weights stored in PyTorch (out, in) layout, biases (out,)."""
    params = []
    fan_in = in_features
    for out_features in list(hidden_layers) + [1]:
        key, kw, kb = jax.random.split(key, 3)
        bound = float(fan_in) ** -0.5
        w = jax.random.uniform(kw, (out_features, fan_in), jnp.float32,
                               minval=-bound, maxval=bound)
        b = jax.random.uniform(kb, (out_features,), jnp.float32,
                               minval=-bound, maxval=bound)
        params.append((w, b))
        fan_in = out_features
    return params


def pi_reference_bf16(x, params):
    """Pure-JAX reference mimicking the kernel numerics: bf16 MXU inputs,
    f32 accumulation, f32 elementwise; layer-1 bias folded (so rounded to
    bf16); final layer fully f32."""
    (w1, b1), (w2, b2), (w3, b3), (w4, b4) = params
    h = jnp.dot(x.astype(jnp.bfloat16), w1.astype(jnp.bfloat16).T,
                preferred_element_type=jnp.float32)
    h = jnp.maximum(h + b1.astype(jnp.bfloat16).astype(jnp.float32), 0.0)
    h = jnp.dot(h.astype(jnp.bfloat16), w2.astype(jnp.bfloat16).T,
                preferred_element_type=jnp.float32)
    h = jnp.maximum(h + b2, 0.0)
    h = jnp.dot(h.astype(jnp.bfloat16), w3.astype(jnp.bfloat16).T,
                preferred_element_type=jnp.float32)
    h = jnp.maximum(h + b3, 0.0)
    y = jnp.sum(h * w4.reshape(1, -1), axis=-1, keepdims=True) + b4
    return jnp.tanh(y)


def pi_reference_f32(x, params):
    """Plain f32 reference (the PyTorch module's math)."""
    (w1, b1), (w2, b2), (w3, b3), (w4, b4) = params
    h = jnp.maximum(x @ w1.T + b1, 0.0)
    h = jnp.maximum(h @ w2.T + b2, 0.0)
    h = jnp.maximum(h @ w3.T + b3, 0.0)
    return jnp.tanh(h @ w4.T + b4)


if __name__ == "__main__":
    key = jax.random.PRNGKey(0)
    key, kx = jax.random.split(key)
    params = init_pi_params(key)

    # Small demo batch (launch-overhead-bound at this size; the same tiled
    # code path streams larger batches).
    x_small = jax.random.normal(kx, (8, IN_FEATURES), dtype=jnp.float32)
    out_small = jax.block_until_ready(pi_forward(x_small, params))
    assert out_small.shape == (8, 1)
    assert jnp.allclose(out_small, pi_reference_bf16(x_small, params),
                        atol=2e-3, rtol=2e-3), "mismatch vs bf16 reference"
    assert jnp.allclose(out_small, pi_reference_f32(x_small, params),
                        atol=5e-2, rtol=5e-2), "mismatch vs f32 reference"

    # Multi-tile path: ragged batch exercises padding + a grid of 3 tiles.
    key, kx2 = jax.random.split(key)
    x_big = jax.random.normal(kx2, (300, IN_FEATURES), dtype=jnp.float32)
    out_big = jax.block_until_ready(pi_forward(x_big, params, block_b=128))
    assert out_big.shape == (300, 1)
    assert jnp.allclose(out_big, pi_reference_bf16(x_big, params),
                        atol=2e-3, rtol=2e-3), "mismatch vs bf16 reference (big)"

    # Megacore-split path: batch large enough that the tile is capped so the
    # parallel grid axis has >= 2 tiles (default block_b).
    key, kx3 = jax.random.split(key)
    x_mid = jax.random.normal(kx3, (2500, IN_FEATURES), dtype=jnp.float32)
    out_mid = jax.block_until_ready(pi_forward(x_mid, params))
    assert out_mid.shape == (2500, 1)
    assert jnp.allclose(out_mid, pi_reference_bf16(x_mid, params),
                        atol=2e-3, rtol=2e-3), "mismatch vs bf16 reference (mid)"

    print("KERNEL_OK")
</pallas_src>

<mosaic_0001>
module attributes {stable_mosaic.version = 11 : i64} {
  func.func @pi_mlp_kernel(%arg0: i32, %arg1: memref<8x128xbf16, #tpu.memory_space<vmem>>, %arg2: memref<128x8xbf16, #tpu.memory_space<vmem>>, %arg3: memref<128x128xbf16, #tpu.memory_space<vmem>>, %arg4: memref<128x1xf32, #tpu.memory_space<vmem>>, %arg5: memref<128x128xbf16, #tpu.memory_space<vmem>>, %arg6: memref<128x1xf32, #tpu.memory_space<vmem>>, %arg7: memref<128x1xf32, #tpu.memory_space<vmem>>, %arg8: memref<1x1xf32, #tpu.memory_space<vmem>>, %arg9: memref<1x128xf32, #tpu.memory_space<vmem>>) attributes {dimension_semantics = [#tpu.dimension_semantics<parallel>], iteration_bounds = array<i64: 1>, scalar_prefetch = 0 : i64, scratch_operands = 0 : i64, tpu.core_type = #tpu.core_type<tc>, window_params = [{transform_indices = @transform_0, window_bounds = array<i64: 8, 128>}, {pipeline_mode = #tpu.pipeline_mode<synchronous>, transform_indices = @transform_1, window_bounds = array<i64: 128, 8>}, {pipeline_mode = #tpu.pipeline_mode<synchronous>, transform_indices = @transform_2, window_bounds = array<i64: 128, 128>}, {pipeline_mode = #tpu.pipeline_mode<synchronous>, transform_indices = @transform_3, window_bounds = array<i64: 128, 1>}, {pipeline_mode = #tpu.pipeline_mode<synchronous>, transform_indices = @transform_4, window_bounds = array<i64: 128, 128>}, {pipeline_mode = #tpu.pipeline_mode<synchronous>, transform_indices = @transform_5, window_bounds = array<i64: 128, 1>}, {pipeline_mode = #tpu.pipeline_mode<synchronous>, transform_indices = @transform_6, window_bounds = array<i64: 128, 1>}, {pipeline_mode = #tpu.pipeline_mode<synchronous>, transform_indices = @transform_7, window_bounds = array<i64: 1, 1>}, {transform_indices = @transform_8, window_bounds = array<i64: 1, 128>}]} {
    %c0 = arith.constant 0 : index
    %c0_0 = arith.constant 0 : index
    %0 = vector.load %arg1[%c0, %c0_0] : memref<8x128xbf16, #tpu.memory_space<vmem>>, vector<8x128xbf16>
    %c0_1 = arith.constant 0 : index
    %c0_2 = arith.constant 0 : index
    %1 = vector.load %arg2[%c0_1, %c0_2] : memref<128x8xbf16, #tpu.memory_space<vmem>>, vector<128x8xbf16>
    %cst = arith.constant dense<0.000000e+00> : vector<128x128xf32>
    %2 = tpu.matmul %1, %0, %cst {dimension_numbers = #tpu.dot_dimension_numbers<[1], [0], [0], [1], [0, 0, 1, 1], [], []>} : vector<128x8xbf16>, vector<8x128xbf16>, vector<128x128xf32> -> vector<128x128xf32>
    %cst_3 = arith.constant 0.000000e+00 : f32
    %3 = vector.broadcast %cst_3 : f32 to vector<128x128xf32>
    %4 = arith.maximumf %2, %3 : vector<128x128xf32>
    %c0_4 = arith.constant 0 : index
    %c0_5 = arith.constant 0 : index
    %5 = vector.load %arg3[%c0_4, %c0_5] : memref<128x128xbf16, #tpu.memory_space<vmem>>, vector<128x128xbf16>
    %6 = arith.truncf %4 : vector<128x128xf32> to vector<128x128xbf16>
    %cst_6 = arith.constant dense<0.000000e+00> : vector<128x128xf32>
    %7 = tpu.matmul %5, %6, %cst_6 {dimension_numbers = #tpu.dot_dimension_numbers<[1], [0], [0], [1], [0, 0, 1, 1], [], []>} : vector<128x128xbf16>, vector<128x128xbf16>, vector<128x128xf32> -> vector<128x128xf32>
    %c0_7 = arith.constant 0 : index
    %c0_8 = arith.constant 0 : index
    %8 = vector.load %arg4[%c0_7, %c0_8] : memref<128x1xf32, #tpu.memory_space<vmem>>, vector<128x1xf32>
    %9 = vector.broadcast %8 : vector<128x1xf32> to vector<128x128xf32>
    %10 = arith.addf %7, %9 : vector<128x128xf32>
    %cst_9 = arith.constant 0.000000e+00 : f32
    %11 = vector.broadcast %cst_9 : f32 to vector<128x128xf32>
    %12 = arith.maximumf %10, %11 : vector<128x128xf32>
    %c0_10 = arith.constant 0 : index
    %c0_11 = arith.constant 0 : index
    %13 = vector.load %arg5[%c0_10, %c0_11] : memref<128x128xbf16, #tpu.memory_space<vmem>>, vector<128x128xbf16>
    %14 = arith.truncf %12 : vector<128x128xf32> to vector<128x128xbf16>
    %cst_12 = arith.constant dense<0.000000e+00> : vector<128x128xf32>
    %15 = tpu.matmul %13, %14, %cst_12 {dimension_numbers = #tpu.dot_dimension_numbers<[1], [0], [0], [1], [0, 0, 1, 1], [], []>} : vector<128x128xbf16>, vector<128x128xbf16>, vector<128x128xf32> -> vector<128x128xf32>
    %c0_13 = arith.constant 0 : index
    %c0_14 = arith.constant 0 : index
    %16 = vector.load %arg6[%c0_13, %c0_14] : memref<128x1xf32, #tpu.memory_space<vmem>>, vector<128x1xf32>
    %17 = vector.broadcast %16 : vector<128x1xf32> to vector<128x128xf32>
    %18 = arith.addf %15, %17 : vector<128x128xf32>
    %cst_15 = arith.constant 0.000000e+00 : f32
    %19 = vector.broadcast %cst_15 : f32 to vector<128x128xf32>
    %20 = arith.maximumf %18, %19 : vector<128x128xf32>
    %c0_16 = arith.constant 0 : index
    %c0_17 = arith.constant 0 : index
    %21 = vector.load %arg7[%c0_16, %c0_17] : memref<128x1xf32, #tpu.memory_space<vmem>>, vector<128x1xf32>
    %22 = vector.broadcast %21 : vector<128x1xf32> to vector<128x128xf32>
    %23 = arith.mulf %20, %22 : vector<128x128xf32>
    %cst_18 = arith.constant dense<0.000000e+00> : vector<128xf32>
    %24 = vector.multi_reduction <add>, %23, %cst_18 [0] : vector<128x128xf32> to vector<128xf32>
    %25 = vector.shape_cast %24 : vector<128xf32> to vector<1x128xf32>
    %c0_19 = arith.constant 0 : index
    %c0_20 = arith.constant 0 : index
    %26 = vector.load %arg8[%c0_19, %c0_20] : memref<1x1xf32, #tpu.memory_space<vmem>>, vector<1x1xf32>
    %27 = vector.broadcast %26 : vector<1x1xf32> to vector<1x128xf32>
    %28 = arith.addf %25, %27 : vector<1x128xf32>
    %29 = math.tanh %28 : vector<1x128xf32>
    %c0_21 = arith.constant 0 : index
    %c0_22 = arith.constant 0 : index
    %30 = vector.load %arg9[%c0_21, %c0_22] : memref<1x128xf32, #tpu.memory_space<vmem>>, vector<1x128xf32>
    tpu.vector_store %arg9[%c0_21, %c0_22], %29 {strides = array<i32>} : memref<1x128xf32, #tpu.memory_space<vmem>>, vector<1x128xf32>,
    return
  }
  func.func @transform_0(%arg0: i32) -> (i32, i32) {
    %c0_i32 = arith.constant 0 : i32
    %c0_i32_0 = arith.constant 0 : i32
    return %c0_i32, %arg0 : i32, i32
  }
  func.func @transform_1(%arg0: i32) -> (i32, i32) {
    %c0_i32 = arith.constant 0 : i32
    %c0_i32_0 = arith.constant 0 : i32
    %c0_i32_1 = arith.constant 0 : i32
    return %c0_i32, %c0_i32_0 : i32, i32
  }
  func.func @transform_2(%arg0: i32) -> (i32, i32) {
    %c0_i32 = arith.constant 0 : i32
    %c0_i32_0 = arith.constant 0 : i32
    %c0_i32_1 = arith.constant 0 : i32
    return %c0_i32, %c0_i32_0 : i32, i32
  }
  func.func @transform_3(%arg0: i32) -> (i32, i32) {
    %c0_i32 = arith.constant 0 : i32
    %c0_i32_0 = arith.constant 0 : i32
    %c0_i32_1 = arith.constant 0 : i32
    return %c0_i32, %c0_i32_0 : i32, i32
  }
  func.func @transform_4(%arg0: i32) -> (i32, i32) {
    %c0_i32 = arith.constant 0 : i32
    %c0_i32_0 = arith.constant 0 : i32
    %c0_i32_1 = arith.constant 0 : i32
    return %c0_i32, %c0_i32_0 : i32, i32
  }
  func.func @transform_5(%arg0: i32) -> (i32, i32) {
    %c0_i32 = arith.constant 0 : i32
    %c0_i32_0 = arith.constant 0 : i32
    %c0_i32_1 = arith.constant 0 : i32
    return %c0_i32, %c0_i32_0 : i32, i32
  }
  func.func @transform_6(%arg0: i32) -> (i32, i32) {
    %c0_i32 = arith.constant 0 : i32
    %c0_i32_0 = arith.constant 0 : i32
    %c0_i32_1 = arith.constant 0 : i32
    return %c0_i32, %c0_i32_0 : i32, i32
  }
  func.func @transform_7(%arg0: i32) -> (i32, i32) {
    %c0_i32 = arith.constant 0 : i32
    %c0_i32_0 = arith.constant 0 : i32
    %c0_i32_1 = arith.constant 0 : i32
    return %c0_i32, %c0_i32_0 : i32, i32
  }
  func.func @transform_8(%arg0: i32) -> (i32, i32) {
    %c0_i32 = arith.constant 0 : i32
    %c0_i32_0 = arith.constant 0 : i32
    return %c0_i32, %arg0 : i32, i32
  }
}

</mosaic_0001>

<bundles_post_ra>
// kernel: pi_forward.1
= control target key start
LH: loop header
LB: loop body
LE: loop exit
PB: predicated region body
PF: predicated region fallthrough
CT: control target
= control target key end

     0   :  { %vm114_vm0 = vcmask 1043456   ;;  %vm89_vm1 = vcmask 64512   ;;  %v946_v33 = vmov 0   ;;  %s1255_s0 = inlined_call_operand.vmem [shape: bf16[8,128], index: 0, kind: input, shape index: {}]   ;;  %s1256_s1 = inlined_call_operand.vmem [shape: bf16[128,8], index: 1, kind: input, shape index: {}]   ;;  %s1257_s3 = inlined_call_operand.vmem [shape: f32[128,1], index: 3, kind: input, shape index: {}]   ;;  %s1258_s5 = inlined_call_operand.vmem [shape: f32[128,1], index: 5, kind: input, shape index: {}]   ;;  %s1259_s2 = inlined_call_operand.vmem [shape: bf16[128,128], index: 2, kind: input, shape index: {}]   ;;  %s1260_s6 = inlined_call_operand.vmem [shape: f32[128,1], index: 6, kind: input, shape index: {}]   ;;  %s1261_s7 = inlined_call_operand.<no memory space> [shape: f32[1,1], index: 7, kind: input, shape index: {}]   ;;  %s1262_s4 = inlined_call_operand.vmem [shape: bf16[128,128], index: 4, kind: input, shape index: {}]   ;;  %s1263_s8 = inlined_call_operand.vmem [shape: f32[1,128], index: 8, kind: output, shape index: {}]  }
   0x1   :  { %v32_v0 = vld [vmem:[%s1255_s0] sm:$0xf]  ;;  %v901_v3 = vld [vmem:[%s1256_s1 + $0x8] sm:$0xff]  ;;  %v902_v4 = vld [vmem:[%s1256_s1 + $0x10] sm:$0xff]  ;;  %941 = vset.pattern.permute.xlu0 %v946_v33  ;;  %942 = vset.pattern.permute.xlu1 %v946_v33 }
   0x2   :  { %v116_v1 = vsel %vm114_vm0, %v32_v0, 0  ;;  %v900_v2 = vld [vmem:[%s1256_s1] sm:$0xff]  ;;  %v903_v5 = vld [vmem:[%s1256_s1 + $0x18] sm:$0xff]  ;;  %v905_v7 = vld [vmem:[%s1256_s1 + $0x28] sm:$0xff]  ;;  %943 = vset.pattern.permute.xlu2 %v946_v33 }
   0x3   :  { %125 = vmatpush.bf16.msra.mxu0 %v116_v1  ;;  %v904_v6 = vld [vmem:[%s1256_s1 + $0x20] sm:$0xff]  ;;  %v906_v8 = vld [vmem:[%s1256_s1 + $0x30] sm:$0xff]  ;;  %v907_v9 = vld [vmem:[%s1256_s1 + $0x38] sm:$0xff] }
   0x4   :  { %v221_v32 = vld [vmem:[%s1257_s3 + $0x70] sm:$0xff]  ;;  %v222_v35 = vld [vmem:[%s1257_s3 + $0x78] sm:$0xff]  ;;  %v219_v36 = vld [vmem:[%s1257_s3 + $0x60] sm:$0xff] }
   0x5   :  { %295 = vperm.xlu0 %941, %v221_v32   ;;  %285 = vperm.xlu1 %942, %v219_v36   ;;  %v215_v38 = vld [vmem:[%s1257_s3 + $0x40] sm:$0xff]  ;;  %v220_v39 = vld [vmem:[%s1257_s3 + $0x68] sm:$0xff]  ;;  %v214_v41 = vld [vmem:[%s1257_s3 + $0x38] sm:$0xff] }
   0x6   :  { %828 = vmatmul.msk.bf16.vlgmr.msra.gmra.mxu0 %vm89_vm1, %v900_v2  ;;  %v216_v42 = vld [vmem:[%s1257_s3 + $0x48] sm:$0xff]  ;;  %v209_v44 = vld [vmem:[%s1257_s3 + $0x10] sm:$0xff]  ;;  %v211_v45 = vld [vmem:[%s1257_s3 + $0x20] sm:$0xff] }
   0x7   :  { %v217_v47 = vld [vmem:[%s1257_s3 + $0x50] sm:$0xff]  ;;  %v208_v48 = vld [vmem:[%s1257_s3 + $0x8] sm:$0xff]  ;;  %v210_v49 = vld [vmem:[%s1257_s3 + $0x18] sm:$0xff] }
   0x8   :  { %275 = vperm.xlu2 %943, %v217_v47   ;;  %v218_v53 = vld [vmem:[%s1257_s3 + $0x58] sm:$0xff]  ;;  %v442_v54 = vld [vmem:[%s1258_s5 + $0x10] sm:$0xff]  ;;  %v440_v57 = vld [vmem:[%s1258_s5] sm:$0xff] }
   0x9   :  { %v213_v61 = vld [vmem:[%s1257_s3 + $0x30] sm:$0xff]  ;;  %v445_v62 = vld [vmem:[%s1258_s5 + $0x28] sm:$0xff]  ;;  %v443_v2 = vld [vmem:[%s1258_s5 + $0x18] sm:$0xff] }
   0xa   :  { %v649_v32 = vld [vmem:[%s1260_s6] sm:$0xff]  ;;  %v662_v33 = vld [vmem:[%s1260_s6 + $0x68] sm:$0xff]  ;;  %v911_v36 = vld [vmem:[%s1259_s2 + $0x18] sm:$0xff] }
   0xd   :  { %300 = vperm.xlu0 %941, %v222_v35   ;;  %290 = vperm.xlu1 %942, %v220_v39   ;;  %v652_v35 = vld [vmem:[%s1260_s6 + $0x18] sm:$0xff]  ;;  %v655_v39 = vld [vmem:[%s1260_s6 + $0x30] sm:$0xff] }
  0x10   :  { %280 = vperm.xlu2 %943, %v218_v53  }
  0x15   :  { %265 = vperm.xlu0 %941, %v215_v38   ;;  %270 = vperm.xlu1 %942, %v216_v42   ;;  %v663_v38 = vld [vmem:[%s1260_s6 + $0x70] sm:$0xff]  ;;  %v661_v42 = vld [vmem:[%s1260_s6 + $0x60] sm:$0xff] }
  0x16   :  { %829 = vmatmul.msk.bf16.gmra.mxu0 %vm89_vm1, %v901_v3 }
  0x18   :  { %255 = vperm.xlu2 %943, %v213_v61  }
  0x1d   :  { %260 = vperm.xlu0 %941, %v214_v41   ;;  %245 = vperm.xlu1 %942, %v211_v45   ;;  %v912_v41 = vld [vmem:[%s1259_s2 + $0x20] sm:$0xff] }
  0x25   :  { %235 = vperm.xlu0 %941, %v209_v44   ;;  %240 = vperm.xlu1 %942, %v210_v49   ;;  %v913_v44 = vld [vmem:[%s1259_s2 + $0x28] sm:$0xff] }
  0x26   :  { %830 = vmatmul.msk.bf16.gmra.mxu0 %vm89_vm1, %v902_v4 }
  0x2d   :  { %230 = vperm.xlu0 %941, %v208_v48   ;;  %458 = vperm.xlu1 %942, %v440_v57  }
  0x35   :  { %468 = vperm.xlu0 %941, %v442_v54   ;;  %473 = vperm.xlu1 %942, %v443_v2  }
  0x36   :  { %831 = vmatmul.msk.bf16.gmra.mxu0 %vm89_vm1, %v903_v5  ;;  %v212_v5 = vld [vmem:[%s1257_s3 + $0x28] sm:$0xff] }
  0x37   :  { %250 = vperm.xlu2 %943, %v212_v5  }
  0x3d   :  { %483 = vperm.xlu0 %941, %v445_v62  }
  0x46   :  { %832 = vmatmul.msk.bf16.gmra.mxu0 %vm89_vm1, %v904_v6  ;;  %v448_v6 = vld [vmem:[%s1258_s5 + $0x40] sm:$0xff] }
  0x47   :  { %498 = vperm.xlu0 %941, %v448_v6  }
  0x56   :  { %833 = vmatmul.msk.bf16.gmra.mxu0 %vm89_vm1, %v905_v7  ;;  %v446_v7 = vld [vmem:[%s1258_s5 + $0x30] sm:$0xff] }
  0x57   :  { %488 = vperm.xlu1 %942, %v446_v7  }
  0x66   :  { %834 = vmatmul.msk.bf16.gmra.mxu0 %vm89_vm1, %v906_v8  ;;  %v207_v8 = vld [vmem:[%s1257_s3] sm:$0xff] }
  0x67   :  { %225 = vperm.xlu2 %943, %v207_v8  }
  0x76   :  { %835 = vmatmul.msk.bf16.gmra.mxu0 %vm89_vm1, %v907_v9  ;;  %v451_v9 = vld [vmem:[%s1258_s5 + $0x58] sm:$0xff] }
  0x77   :  { %513 = vperm.xlu0 %941, %v451_v9   ;;  %v296_v45 = vpop.permute.xlu0 %295 }
  0x7f   :  { %v301_v47 = vpop.permute.xlu0 %300 }
  0x83   :  { %v127_v10 = vpop.f32.mrf.mxu0 }
  0x84   :  { %v167_v12 = vmax.f32 %v127_v10, 0.0  ;;  %v449_v10 = vld [vmem:[%s1258_s5 + $0x48] sm:$0xff] }
  0x85   :  { %503 = vperm.xlu1 %942, %v449_v10  }
  0x87   :  { %v266_v49 = vpop.permute.xlu0 %265 }
  0x8b   :  { %v129_v11 = vpop.f32.mrf.mxu0 }
  0x8c   :  { %v168_v13 = vmax.f32 %v129_v11, 0.0  ;;  %v441_v11 = vld [vmem:[%s1258_s5 + $0x8] sm:$0xff] }
  0x8d   :  { %463 = vperm.xlu2 %943, %v441_v11  }
  0x8e   :  { %v1019_v14 = vpack.c.bf16 %v168_v13, %v167_v12  ;;  %v908_v12 = vld [vmem:[%s1259_s2] sm:$0xff]  ;;  %v914_v13 = vld [vmem:[%s1259_s2 + $0x30] sm:$0xff] }
  0x93   :  { %v132_v15 = vpop.f32.mrf.mxu0 }
  0x94   :  { %v169_v17 = vmax.f32 %v132_v15, 0.0  ;;  %v454_v15 = vld [vmem:[%s1258_s5 + $0x70] sm:$0xff] }
  0x95   :  { %528 = vperm.xlu0 %941, %v454_v15  }
  0x9b   :  { %v134_v16 = vpop.f32.mrf.mxu0 }
  0x9c   :  { %v170_v18 = vmax.f32 %v134_v16, 0.0  ;;  %v452_v16 = vld [vmem:[%s1258_s5 + $0x60] sm:$0xff] }
  0x9d   :  { %518 = vperm.xlu1 %942, %v452_v16  }
  0x9e   :  { %v1021_v19 = vpack.c.bf16 %v170_v18, %v169_v17  ;;  %v444_v17 = vld [vmem:[%s1258_s5 + $0x20] sm:$0xff]  ;;  %v650_v18 = vld [vmem:[%s1260_s6 + $0x8] sm:$0xff] }
  0x9f   :  { %478 = vperm.xlu2 %943, %v444_v17   ;;  %672 = vperm.xlu0 %941, %v650_v18  }
  0xa3   :  { %v137_v20 = vpop.f32.mrf.mxu0 }
  0xa4   :  { %v171_v22 = vmax.f32 %v137_v20, 0.0  ;;  %v909_v20 = vld [vmem:[%s1259_s2 + $0x8] sm:$0xff] }
  0xab   :  { %v139_v21 = vpop.f32.mrf.mxu0 }
  0xac   :  { %v172_v23 = vmax.f32 %v139_v21, 0.0  ;;  %v915_v21 = vld [vmem:[%s1259_s2 + $0x38] sm:$0xff] }
  0xae   :  { %v1023_v24 = vpack.c.bf16 %v172_v23, %v171_v22  ;;  %v653_v22 = vld [vmem:[%s1260_s6 + $0x20] sm:$0xff]  ;;  %v651_v23 = vld [vmem:[%s1260_s6 + $0x10] sm:$0xff] }
  0xaf   :  { %687 = vperm.xlu0 %941, %v653_v22  }
  0xb3   :  { %v142_v25 = vpop.f32.mrf.mxu0 }
  0xb4   :  { %v173_v27 = vmax.f32 %v142_v25, 0.0  ;;  %v656_v25 = vld [vmem:[%s1260_s6 + $0x38] sm:$0xff] }
  0xb7   :  { %702 = vperm.xlu0 %941, %v656_v25  }
  0xbb   :  { %v144_v26 = vpop.f32.mrf.mxu0 }
  0xbc   :  { %v174_v28 = vmax.f32 %v144_v26, 0.0  ;;  %v654_v26 = vld [vmem:[%s1260_s6 + $0x28] sm:$0xff] }
  0xbe   :  { %v1025_v29 = vpack.c.bf16 %v174_v28, %v173_v27  ;;  %v453_v27 = vld [vmem:[%s1258_s5 + $0x68] sm:$0xff]  ;;  %v910_v28 = vld [vmem:[%s1259_s2 + $0x10] sm:$0xff] }
  0xc3   :  { %v1027_v30 = vpop.f32.mrf.mxu0 }
  0xc4   :  { %v175_v3 = vmax.f32 %v1027_v30, 0.0  ;;  %v657_v30 = vld [vmem:[%s1260_s6 + $0x40] sm:$0xff] }
  0xcb   :  { %v1029_v31 = vpop.f32.mrf.mxu0 }
  0xcc   :  { %v176_v0 = vmax.f32 %v1029_v31, 0.0  ;;  %v13_v31 = vstv %s1261_s7 }
  0xcd   :  { %14 = vst [vmem:[#allocation2] sm:$0x1] %v13_v31 }
  0xce   :  { %v203_v4 = vpack.c.bf16 %v176_v0, %v175_v3 }
  0xd3   :  { %v152_v34 = vpop.f32.mrf.mxu0 }
  0xd4   :  { %v177_v63 = vmax.f32 %v152_v34, 0.0  ;;  %v660_v34 = vld [vmem:[%s1260_s6 + $0x58] sm:$0xff] }
  0xdb   :  { %v154_v37 = vpop.f32.mrf.mxu0 }
  0xdc   :  { %v178_v59 = vmax.f32 %v154_v37, 0.0  ;;  %v782_v37 = vld [vmem:[#allocation2] sm:$0x1] }
  0xde   :  { %v204_v1 = vpack.c.bf16 %v178_v59, %v177_v63 }
  0xe3   :  { %v157_v40 = vpop.f32.mrf.mxu0 }
  0xe4   :  { %v179_v58 = vmax.f32 %v157_v40, 0.0  ;;  %v658_v40 = vld [vmem:[%s1260_s6 + $0x48] sm:$0xff] }
  0xeb   :  { %v159_v43 = vpop.f32.mrf.mxu0 }
  0xec   :  { %v180_v55 = vmax.f32 %v159_v43, 0.0  ;;  %v664_v43 = vld [vmem:[%s1260_s6 + $0x78] sm:$0xff] }
  0xee   :  { %v205_v60 = vpack.c.bf16 %v180_v55, %v179_v58 }
  0xf3   :  { %v162_v46 = vpop.f32.mrf.mxu0 }
  0xf4   :  { %v181_v51 = vmax.f32 %v162_v46, 0.0  ;;  %v276_v46 = vpop.permute.xlu2 %275 }
  0xfb   :  { %v164_v50 = vpop.f32.mrf.mxu0 }
  0xfc   :  { %v182_v52 = vmax.f32 %v164_v50, 0.0  ;;  %v281_v48 = vpop.permute.xlu2 %280  ;;  %v286_v50 = vpop.permute.xlu1 %285 }
  0xfe   :  { %v206_v56 = vpack.c.bf16 %v182_v52, %v181_v51  ;;  %v261_v52 = vpop.permute.xlu0 %260 }
 0x100   :  { %351 = vmatpush.bf16.msra.mxu1 %v206_v56  ;;  %924 = vmatpush.bf16.msra.mxu3 %v206_v56 }
 0x104   :  { %352 = vmatpush.bf16.msra.mxu1 %v205_v60  ;;  %925 = vmatpush.bf16.msra.mxu3 %v205_v60  ;;  %v256_v51 = vpop.permute.xlu2 %255  ;;  %v291_v53 = vpop.permute.xlu1 %290 }
 0x106   :  { %v236_v55 = vpop.permute.xlu0 %235 }
 0x108   :  { %353 = vmatpush.bf16.msra.mxu1 %v204_v1  ;;  %926 = vmatpush.bf16.msra.mxu3 %v204_v1 }
 0x10c   :  { %354 = vmatpush.bf16.msra.mxu1 %v203_v4  ;;  %927 = vmatpush.bf16.msra.mxu3 %v203_v4  ;;  %v251_v54 = vpop.permute.xlu2 %250  ;;  %v271_v57 = vpop.permute.xlu1 %270 }
 0x10e   :  { %v231_v61 = vpop.permute.xlu0 %230 }
 0x110   :  { %355 = vmatpush.bf16.msra.mxu1 %v1025_v29  ;;  %928 = vmatpush.bf16.msra.mxu3 %v1025_v29  ;;  %v659_v29 = vld [vmem:[%s1260_s6 + $0x50] sm:$0xff] }
 0x111   :  { %717 = vperm.xlu0 %941, %v659_v29  }
 0x114   :  { %356 = vmatpush.bf16.msra.mxu1 %v1023_v24  ;;  %929 = vmatpush.bf16.msra.mxu3 %v1023_v24  ;;  %v450_v24 = vld [vmem:[%s1258_s5 + $0x50] sm:$0xff]  ;;  %v226_v58 = vpop.permute.xlu2 %225  ;;  %v246_v3 = vpop.permute.xlu1 %245 }
 0x118   :  { %357 = vmatpush.bf16.msra.mxu1 %v1021_v19  ;;  %930 = vmatpush.bf16.msra.mxu3 %v1021_v19  ;;  %v447_v19 = vld [vmem:[%s1258_s5 + $0x38] sm:$0xff] }
 0x119   :  { %493 = vperm.xlu2 %943, %v447_v19   ;;  %732 = vperm.xlu0 %941, %v662_v33  }
 0x11c   :  { %358 = vmatpush.bf16.msra.mxu1 %v1019_v14  ;;  %931 = vmatpush.bf16.msra.mxu3 %v1019_v14  ;;  %v455_v14 = vld [vmem:[%s1258_s5 + $0x78] sm:$0xff]  ;;  %v241_v8 = vpop.permute.xlu1 %240 }
 0x11d   :  { %533 = vperm.xlu1 %942, %v455_v14  }
 0x11f   :  { %359 = vmatmul.bf16.vlgmr.msra.gmra.mxu1 %v908_v12  ;;  %389 = vmatmul.bf16.vlgmr.msra.gmra.mxu3 %v914_v13 }
 0x121   :  { %508 = vperm.xlu2 %943, %v450_v24   ;;  %785 = vperm.xlu0 %941, %v782_v37  }
 0x125   :  { %677 = vperm.xlu1 %942, %v651_v23  }
 0x129   :  { %523 = vperm.xlu2 %943, %v453_v27  }
 0x12d   :  { %692 = vperm.xlu1 %942, %v654_v26  }
 0x12f   :  { %364 = vmatmul.bf16.gmra.mxu1 %v909_v20  ;;  %394 = vmatmul.bf16.gmra.mxu3 %v915_v21 }
 0x131   :  { %667 = vperm.xlu2 %943, %v649_v32  }
 0x135   :  { %707 = vperm.xlu1 %942, %v657_v30  }
 0x139   :  { %682 = vperm.xlu2 %943, %v652_v35  }
 0x13d   :  { %722 = vperm.xlu1 %942, %v660_v34  }
 0x13f   :  { %369 = vmatmul.bf16.gmra.mxu1 %v910_v28 }
 0x141   :  { %697 = vperm.xlu2 %943, %v655_v39  }
 0x145   :  { %737 = vperm.xlu1 %942, %v663_v38  }
 0x149   :  { %712 = vperm.xlu2 %943, %v658_v40  }
 0x14f   :  { %374 = vmatmul.bf16.gmra.mxu1 %v911_v36 }
 0x151   :  { %727 = vperm.xlu2 %943, %v661_v42  }
 0x159   :  { %742 = vperm.xlu2 %943, %v664_v43  }
 0x15f   :  { %379 = vmatmul.bf16.gmra.mxu1 %v912_v41 }
 0x16f   :  { %384 = vmatmul.bf16.gmra.mxu1 %v913_v44 }
 0x19c   :  { %v360_v56 = vpop.f32.mrf.mxu1 }
 0x19d   :  { %v361_v60 = vadd.f32 %v360_v56, %v226_v58  ;;  %v923_v56 = vld [vmem:[%s1262_s4 + $0x38] sm:$0xff] }
 0x19e   :  { %v919_v58 = vld [vmem:[%s1262_s4 + $0x18] sm:$0xff] }
 0x19f   :  { %v400_v0 = vmax.f32 %v361_v60, 0.0  ;;  %v921_v60 = vld [vmem:[%s1262_s4 + $0x28] sm:$0xff] }
 0x1a2   :  { %v390_v59 = vpop.f32.mrf.mxu3 }
 0x1a3   :  { %v391_v15 = vadd.f32 %v390_v59, %v286_v50  ;;  %v920_v59 = vld [vmem:[%s1262_s4 + $0x20] sm:$0xff] }
 0x1a4   :  { %v362_v62 = vpop.f32.mrf.mxu1 }
 0x1a5   :  { %v363_v63 = vadd.f32 %v362_v62, %v231_v61  ;;  %v412_v21 = vmax.f32 %v391_v15, 0.0  ;;  %v459_v61 = vpop.permute.xlu1 %458  ;;  %v464_v62 = vpop.permute.xlu2 %463 }
 0x1a7   :  { %v401_v1 = vmax.f32 %v363_v63, 0.0 }
 0x1a9   :  { %v1212_v2 = vpack.c.bf16 %v401_v1, %v400_v0  ;;  %v469_v0 = vpop.permute.xlu0 %468 }
 0x1aa   :  { %v392_v4 = vpop.f32.mrf.mxu3 }
 0x1ab   :  { %v393_v16 = vadd.f32 %v392_v4, %v291_v53 }
 0x1ac   :  { %v365_v5 = vpop.f32.mrf.mxu1 }
 0x1ad   :  { %v366_v7 = vadd.f32 %v365_v5, %v236_v55  ;;  %v413_v22 = vmax.f32 %v393_v16, 0.0  ;;  %v474_v1 = vpop.permute.xlu1 %473 }
 0x1af   :  { %v402_v11 = vmax.f32 %v366_v7, 0.0  ;;  %v438_v25 = vpack.c.bf16 %v413_v22, %v412_v21 }
 0x1b1   :  { %v484_v4 = vpop.permute.xlu0 %483 }
 0x1b2   :  { %v395_v6 = vpop.f32.mrf.mxu3 }
 0x1b3   :  { %v396_v13 = vadd.f32 %v395_v6, %v296_v45 }
 0x1b4   :  { %v367_v9 = vpop.f32.mrf.mxu1 }
 0x1b5   :  { %v368_v10 = vadd.f32 %v367_v9, %v241_v8  ;;  %v414_v14 = vmax.f32 %v396_v13, 0.0  ;;  %v489_v6 = vpop.permute.xlu1 %488 }
 0x1b7   :  { %v403_v12 = vmax.f32 %v368_v10, 0.0 }
 0x1b9   :  { %v433_v17 = vpack.c.bf16 %v403_v12, %v402_v11  ;;  %v499_v9 = vpop.permute.xlu0 %498 }
 0x1ba   :  { %v397_v18 = vpop.f32.mrf.mxu3 }
 0x1bb   :  { %v398_v19 = vadd.f32 %v397_v18, %v301_v47 }
 0x1bc   :  { %v370_v20 = vpop.f32.mrf.mxu1 }
 0x1bd   :  { %v415_v23 = vmax.f32 %v398_v19, 0.0  ;;  %v371_v50 = vadd.f32 %v370_v20, %v246_v3  ;;  %v479_v3 = vpop.permute.xlu2 %478  ;;  %v504_v10 = vpop.permute.xlu1 %503 }
 0x1bf   :  { %v439_v24 = vpack.c.bf16 %v415_v23, %v414_v14 }
 0x1c1   :  { %584 = vmatpush.bf16.msra.mxu2 %v439_v24  ;;  %932 = vmatpush.bf16.msrb.mxu3 %v439_v24  ;;  %v1240_v13 = vpop.permute.xlu0 %513 }
 0x1c4   :  { %v372_v26 = vpop.f32.mrf.mxu1 }
 0x1c5   :  { %585 = vmatpush.bf16.msra.mxu2 %v438_v25  ;;  %933 = vmatpush.bf16.msrb.mxu3 %v438_v25  ;;  %v373_v44 = vadd.f32 %v372_v26, %v251_v54  ;;  %v917_v54 = vld [vmem:[%s1262_s4 + $0x8] sm:$0xff]  ;;  %v494_v7 = vpop.permute.xlu2 %493  ;;  %v519_v15 = vpop.permute.xlu1 %518 }
 0x1c9   :  { %v1244_v18 = vpop.permute.xlu0 %528 }
 0x1cc   :  { %v375_v27 = vpop.f32.mrf.mxu1 }
 0x1cd   :  { %v376_v42 = vadd.f32 %v375_v27, %v256_v51  ;;  %v916_v51 = vld [vmem:[%s1262_s4] sm:$0xff]  ;;  %v509_v11 = vpop.permute.xlu2 %508  ;;  %v1246_v14 = vpop.permute.xlu1 %533 }
 0x1cf   :  { %v406_v53 = vmax.f32 %v376_v42, 0.0 }
 0x1d1   :  { %v673_v21 = vpop.permute.xlu0 %672 }
 0x1d4   :  { %v377_v28 = vpop.f32.mrf.mxu1 }
 0x1d5   :  { %v378_v39 = vadd.f32 %v377_v28, %v261_v52  ;;  %v922_v52 = vld [vmem:[%s1262_s4 + $0x30] sm:$0xff]  ;;  %v1242_v16 = vpop.permute.xlu2 %523  ;;  %v678_v23 = vpop.permute.xlu1 %677 }
 0x1d7   :  { %v407_v45 = vmax.f32 %v378_v39, 0.0 }
 0x1d9   :  { %v435_v55 = vpack.c.bf16 %v407_v45, %v406_v53 }
 0x1dc   :  { %v380_v29 = vpop.f32.mrf.mxu1 }
 0x1dd   :  { %v381_v36 = vadd.f32 %v380_v29, %v266_v49  ;;  %v668_v20 = vpop.permute.xlu2 %667 }
 0x1df   :  { %v408_v43 = vmax.f32 %v381_v36, 0.0 }
 0x1e4   :  { %v382_v30 = vpop.f32.mrf.mxu1 }
 0x1e5   :  { %v383_v34 = vadd.f32 %v382_v30, %v271_v57  ;;  %v918_v57 = vld [vmem:[%s1262_s4 + $0x10] sm:$0xff]  ;;  %v683_v24 = vpop.permute.xlu2 %682  ;;  %v688_v30 = vpop.permute.xlu0 %687 }
 0x1e7   :  { %v409_v40 = vmax.f32 %v383_v34, 0.0 }
 0x1e9   :  { %v436_v47 = vpack.c.bf16 %v409_v40, %v408_v43 }
 0x1ec   :  { %v385_v31 = vpop.f32.mrf.mxu1 }
 0x1ed   :  { %v386_v32 = vadd.f32 %v385_v31, %v276_v46  ;;  %v405_v46 = vmax.f32 %v373_v44, 0.0  ;;  %v698_v34 = vpop.permute.xlu2 %697 }
 0x1ef   :  { %v410_v37 = vmax.f32 %v386_v32, 0.0 }
 0x1f4   :  { %v387_v33 = vpop.f32.mrf.mxu1 }
 0x1f5   :  { %v388_v35 = vadd.f32 %v387_v33, %v281_v48  ;;  %v404_v48 = vmax.f32 %v371_v50, 0.0  ;;  %v693_v33 = vpop.permute.xlu1 %692 }
 0x1f7   :  { %v411_v38 = vmax.f32 %v388_v35, 0.0  ;;  %v434_v49 = vpack.c.bf16 %v405_v46, %v404_v48  ;;  %v703_v48 = vpop.permute.xlu0 %702 }
 0x1f9   :  { %v437_v41 = vpack.c.bf16 %v411_v38, %v410_v37 }
 0x1fb   :  { %586 = vmatpush.bf16.msra.mxu2 %v437_v41  ;;  %934 = vmatpush.bf16.msrb.mxu3 %v437_v41 }
 0x1ff   :  { %587 = vmatpush.bf16.msra.mxu2 %v436_v47  ;;  %935 = vmatpush.bf16.msrb.mxu3 %v436_v47 }
 0x203   :  { %588 = vmatpush.bf16.msra.mxu2 %v435_v55  ;;  %936 = vmatpush.bf16.msrb.mxu3 %v435_v55 }
 0x207   :  { %589 = vmatpush.bf16.msra.mxu2 %v434_v49  ;;  %937 = vmatpush.bf16.msrb.mxu3 %v434_v49 }
 0x20b   :  { %590 = vmatpush.bf16.msra.mxu2 %v433_v17  ;;  %938 = vmatpush.bf16.msrb.mxu3 %v433_v17 }
 0x20f   :  { %591 = vmatpush.bf16.msra.mxu2 %v1212_v2  ;;  %939 = vmatpush.bf16.msrb.mxu3 %v1212_v2 }
 0x212   :  { %592 = vmatmul.bf16.vlgmr.msra.gmra.mxu2 %v916_v51  ;;  %622 = vmatmul.bf16.vlgmr.msrb.gmra.mxu3 %v922_v52 }
 0x222   :  { %597 = vmatmul.bf16.gmra.mxu2 %v917_v54  ;;  %627 = vmatmul.bf16.gmra.mxu3 %v923_v56  ;;  %v708_v56 = vpop.permute.xlu1 %707 }
 0x232   :  { %602 = vmatmul.bf16.gmra.mxu2 %v918_v57  ;;  %v713_v57 = vpop.permute.xlu2 %712 }
 0x242   :  { %607 = vmatmul.bf16.gmra.mxu2 %v919_v58 }
 0x252   :  { %612 = vmatmul.bf16.gmra.mxu2 %v920_v59 }
 0x262   :  { %617 = vmatmul.bf16.gmra.mxu2 %v921_v60 }
 0x295   :  { %v593_v63 = vpop.f32.mrf.mxu2  ;;  %v623_v25 = vpop.f32.mrf.mxu3 }
 0x296   :  { %v594_v28 = vadd.f32 %v593_v63, %v459_v61 }
 0x298   :  { %v633_v35 = vmax.f32 %v594_v28, 0.0 }
 0x29a   :  { %v745_v43 = vmul.f32 %v668_v20, %v633_v35 }
 0x29d   :  { %v595_v2 = vpop.f32.mrf.mxu2  ;;  %v625_v38 = vpop.f32.mrf.mxu3 }
 0x29e   :  { %v596_v26 = vadd.f32 %v595_v2, %v464_v62 }
 0x2a0   :  { %v634_v31 = vmax.f32 %v596_v26, 0.0 }
 0x2a2   :  { %v746_v39 = vmul.f32 %v673_v21, %v634_v31  ;;  %v723_v21 = vpop.permute.xlu1 %722 }
 0x2a4   :  { %v761_v50 = vadd.f32 %v746_v39, %v745_v43 }
 0x2a5   :  { %v598_v5 = vpop.f32.mrf.mxu2  ;;  %v628_v62 = vpop.f32.mrf.mxu3 }
 0x2a6   :  { %v599_v29 = vadd.f32 %v598_v5, %v469_v0 }
 0x2a8   :  { %v635_v36 = vmax.f32 %v599_v29, 0.0  ;;  %v629_v29 = vadd.f32 %v628_v62, %v1244_v18 }
 0x2aa   :  { %v747_v44 = vmul.f32 %v678_v23, %v635_v36  ;;  %v647_v35 = vmax.f32 %v629_v29, 0.0 }
 0x2ac   :  { %v762_v49 = vadd.f32 %v761_v50, %v747_v44 }
 0x2ad   :  { %v600_v8 = vpop.f32.mrf.mxu2 }
 0x2ae   :  { %v601_v32 = vadd.f32 %v600_v8, %v474_v1 }
 0x2b0   :  { %v636_v40 = vmax.f32 %v601_v32, 0.0 }
 0x2b2   :  { %v748_v53 = vmul.f32 %v683_v24, %v636_v40 }
 0x2b4   :  { %v763_v58 = vadd.f32 %v762_v49, %v748_v53 }
 0x2b5   :  { %v603_v12 = vpop.f32.mrf.mxu2 }
 0x2b6   :  { %v604_v37 = vadd.f32 %v603_v12, %v479_v3 }
 0x2b8   :  { %v637_v45 = vmax.f32 %v604_v37, 0.0 }
 0x2ba   :  { %v749_v51 = vmul.f32 %v688_v30, %v637_v45 }
 0x2bc   :  { %v764_v0 = vadd.f32 %v763_v58, %v749_v51 }
 0x2bd   :  { %v605_v17 = vpop.f32.mrf.mxu2 }
 0x2be   :  { %v606_v41 = vadd.f32 %v605_v17, %v484_v4  ;;  %v718_v17 = vpop.permute.xlu0 %717 }
 0x2c0   :  { %v638_v46 = vmax.f32 %v606_v41, 0.0 }
 0x2c2   :  { %v750_v59 = vmul.f32 %v693_v33, %v638_v46 }
 0x2c4   :  { %v765_v4 = vadd.f32 %v764_v0, %v750_v59 }
 0x2c5   :  { %v608_v19 = vpop.f32.mrf.mxu2 }
 0x2c6   :  { %v609_v47 = vadd.f32 %v608_v19, %v489_v6 }
 0x2c8   :  { %v639_v52 = vmax.f32 %v609_v47, 0.0 }
 0x2ca   :  { %v751_v1 = vmul.f32 %v698_v34, %v639_v52 }
 0x2cd   :  { %v610_v22 = vpop.f32.mrf.mxu2 }
 0x2ce   :  { %v611_v55 = vadd.f32 %v610_v22, %v494_v7  ;;  %v766_v7 = vadd.f32 %v765_v4, %v751_v1 }
 0x2d0   :  { %v640_v60 = vmax.f32 %v611_v55, 0.0 }
 0x2d2   :  { %v752_v5 = vmul.f32 %v703_v48, %v640_v60 }
 0x2d4   :  { %v767_v19 = vadd.f32 %v766_v7, %v752_v5 }
 0x2d5   :  { %v613_v27 = vpop.f32.mrf.mxu2 }
 0x2d6   :  { %v614_v54 = vadd.f32 %v613_v27, %v499_v9  ;;  %v624_v9 = vadd.f32 %v623_v25, %v519_v15  ;;  %v728_v27 = vpop.permute.xlu2 %727 }
 0x2d8   :  { %v641_v2 = vmax.f32 %v614_v54, 0.0  ;;  %v645_v28 = vmax.f32 %v624_v9, 0.0 }
 0x2da   :  { %v753_v8 = vmul.f32 %v708_v56, %v641_v2  ;;  %v757_v34 = vmul.f32 %v728_v27, %v645_v28 }
 0x2dc   :  { %v768_v23 = vadd.f32 %v767_v19, %v753_v8 }
 0x2dd   :  { %v615_v42 = vpop.f32.mrf.mxu2 }
 0x2de   :  { %v616_v61 = vadd.f32 %v615_v42, %v504_v10  ;;  %v626_v10 = vadd.f32 %v625_v38, %v1242_v16  ;;  %v733_v16 = vpop.permute.xlu0 %732  ;;  %v743_v42 = vpop.permute.xlu2 %742 }
 0x2e0   :  { %v642_v6 = vmax.f32 %v616_v61, 0.0  ;;  %v646_v32 = vmax.f32 %v626_v10, 0.0 }
 0x2e2   :  { %v754_v20 = vmul.f32 %v713_v57, %v642_v6  ;;  %v758_v37 = vmul.f32 %v733_v16, %v646_v32 }
 0x2e4   :  { %v769_v30 = vadd.f32 %v768_v23, %v754_v20 }
 0x2e5   :  { %v618_v63 = vpop.f32.mrf.mxu2 }
 0x2e6   :  { %v619_v3 = vadd.f32 %v618_v63, %v509_v11  ;;  %v630_v11 = vpop.f32.mrf.mxu3  ;;  %v786_v53 = vpop.permute.xlu0 %785 }
 0x2e7   :  { %v631_v15 = vadd.f32 %v630_v11, %v1246_v14  ;;  %v788_v55 = vperm.slane %v786_v53, 0 }
 0x2e8   :  { %v643_v12 = vmax.f32 %v619_v3, 0.0 }
 0x2e9   :  { %v648_v38 = vmax.f32 %v631_v15, 0.0 }
 0x2ea   :  { %v755_v24 = vmul.f32 %v718_v17, %v643_v12 }
 0x2eb   :  { %v760_v43 = vmul.f32 %v743_v42, %v648_v38 }
 0x2ec   :  { %v770_v25 = vadd.f32 %v769_v30, %v755_v24 }
 0x2ed   :  { %v620_v22 = vpop.f32.mrf.mxu2 }
 0x2ee   :  { %v621_v26 = vadd.f32 %v620_v22, %v1240_v13  ;;  %v738_v13 = vpop.permute.xlu1 %737 }
 0x2ef   :  { %v759_v40 = vmul.f32 %v738_v13, %v647_v35 }
 0x2f0   :  { %v644_v31 = vmax.f32 %v621_v26, 0.0 }
 0x2f2   :  { %v756_v33 = vmul.f32 %v723_v21, %v644_v31 }
 0x2f4   :  { %v771_v36 = vadd.f32 %v770_v25, %v756_v33 }
 0x2f6   :  { %v772_v39 = vadd.f32 %v771_v36, %v757_v34 }
 0x2f8   :  { %v773_v41 = vadd.f32 %v772_v39, %v758_v37 }
 0x2fa   :  { %v774_v18 = vadd.f32 %v773_v41, %v759_v40 }
 0x2fc   :  { %v775_v44 = vadd.f32 %v774_v18, %v760_v43 }
 0x2fe   :  { %v776_v45 = vrot.slane %v775_v44, 4 }
 0x300   :  { %v777_v47 = vadd.f32 %v776_v45, %v775_v44 }
 0x302   :  { %v778_v50 = vrot.slane %v777_v47, 2 }
 0x304   :  { %v779_v14 = vadd.f32 %v778_v50, %v777_v47 }
 0x306   :  { %v780_v46 = vrot.slane %v779_v14, 1 }
 0x308   :  { %v781_v48 = vadd.f32 %v780_v46, %v779_v14 }
 0x30a   :  { %v789_v49 = vadd.f32 %v788_v55, %v781_v48 }
 0x30c   :  { %944 = vtanh.f32 %v789_v49 }
 0x312   :  { %v945_v51 = vpop.eup %944 }
 0x313   :  { %791 = vst [vmem:[%s1263_s8] sm:$0x1] %v945_v51 }

</bundles_post_ra>
